<compile_context>
chip_gen: v7x
topology: tpu7x:2x2x1
jax: 0.10.0
libtpu: 0.0.40
codegen_flags: <defaults>
</compile_context>

<pallas_src>
import jax
import jax.numpy as jnp
from jax.experimental import pallas as pl
from jax.experimental.pallas import tpu as pltpu


def value_net_kernel(xt_ref, w1_ref, w2_ref, b2_ref, o_ref):
    # fc1 + bias on the MXU: [W1 | b1] [H, S+1] @ [x^T ; 1] [S+1, bb] -> f32.
    h = jnp.dot(w1_ref[...], xt_ref[...], preferred_element_type=jnp.float32)
    h = jnp.maximum(h, 0.0)                                   # relu (VPU), [H, bb]
    # fc2 on the MXU: w2 [1, H] bf16 @ relu(h) bf16 -> [1, bb] f32 accumulate.
    y = jnp.dot(w2_ref[...], h.astype(jnp.bfloat16),
                preferred_element_type=jnp.float32)
    # Lane-dense store: one [1, block_b] f32 row per grid step (unmasked vst).
    o_ref[...] = (y + b2_ref[0]).astype(o_ref.dtype)


def _per_lane_bytes(S, H):
    # Per lane of block_b, per grid step:
    #   x^T tile   : (S+1) bf16 elems, double-buffered  -> 2*(S+1)*2
    #   out tile   : 1 f32 elem, double-buffered        -> 2*4
    #   h / relu(h) / bf16(h) intermediates (conservative ~4 f32 copies of H)
    return 2 * (S + 1) * 2 + 2 * 4 + 4 * H * 4


def _pick_block_b(B, S, H):
    budget = 12 << 20  # stays under v5e's 16 MiB scoped-VMEM default
    max_block = min(65536, max(128, (budget // _per_lane_bytes(S, H)) // 128 * 128))
    lanes_needed = 128 * pl.cdiv(B, 128)
    if lanes_needed <= max_block:
        if lanes_needed >= 256:
            # >=2 grid steps so the "parallel" batch axis can use both v7x TCs.
            return 128 * pl.cdiv(lanes_needed // 2, 128)
        return lanes_needed
    # Large batch: split evenly across the minimum number of max-size tiles
    # (minimizes padded/wasted lanes in the last tile).
    nb = pl.cdiv(lanes_needed, max_block)
    return 128 * pl.cdiv(pl.cdiv(lanes_needed, nb), 128)


def value_net_forward(x, w1, b1, w2, b2, *, block_b=None):
    """x: [B, state_dim]; w1: [H, S]; b1: [H]; w2: [1, H]; b2: [1].
       Returns [B, 1] float32 (same semantics as ValueNet.forward; fc1/fc2
       operands are bf16-quantized for the MXU, accumulation is f32)."""
    B, S = x.shape
    H = w1.shape[0]

    if block_b is None:
        block_b = _pick_block_b(B, S, H)
    assert block_b % 128 == 0, "block_b must be a multiple of 128 (lane width)"
    num_blocks = pl.cdiv(B, block_b)
    bp = num_blocks * block_b

    # Raise the scoped-VMEM limit to match the chosen tile (with headroom),
    # but keep it far below v7x's 64 MiB physical VMEM.
    vmem_limit = int(min(max(_per_lane_bytes(S, H) * block_b * 3 // 2, 16 << 20),
                         48 << 20))

    # Layout plumbing (fused into the pallas_call operand where possible):
    # pad batch to the tile multiple, move batch onto lanes, cast to bf16, and
    # append a row of ones so b1 rides along in the fc1 matmul.
    x_t = jnp.pad(x.astype(jnp.bfloat16), ((0, bp - B), (0, 0))).T        # [S, bp]
    xt_aug = jnp.concatenate(
        [x_t, jnp.ones((1, bp), jnp.bfloat16)], axis=0)                   # [S+1, bp]
    w1_aug = jnp.concatenate(
        [w1, b1.reshape(H, 1)], axis=1).astype(jnp.bfloat16)              # [H, S+1]
    w2_b = w2.reshape(1, H).astype(jnp.bfloat16)                          # [1, H]
    b2_s = b2.reshape(1).astype(jnp.float32)                              # [1] scalar

    out_row = pl.pallas_call(
        value_net_kernel,
        out_shape=jax.ShapeDtypeStruct((1, bp), jnp.float32),
        grid_spec=pltpu.PrefetchScalarGridSpec(
            num_scalar_prefetch=0,
            grid=(num_blocks,),
            in_specs=[
                # Streamed x^T tile.  (If traces still show exposed DMA at the
                # start of each step, add pipeline_mode=pl.Buffered(3) here.)
                pl.BlockSpec((S + 1, block_b), lambda i: (0, i)),
                pl.BlockSpec((H, S + 1), lambda i: (0, 0)),      # resident [W1|b1]
                pl.BlockSpec((1, H), lambda i: (0, 0)),          # resident w2
                pl.BlockSpec(memory_space=pltpu.MemorySpace.SMEM),  # b2 scalar
            ],
            out_specs=pl.BlockSpec((1, block_b), lambda i: (0, i)),  # lane-dense
        ),
        compiler_params=pltpu.CompilerParams(
            dimension_semantics=("parallel",),            # batch tiles independent
            allow_input_fusion=[True, False, False, False],  # fuse x^T prep
            vmem_limit_bytes=vmem_limit,
        ),
    )(xt_aug, w1_aug, w2_b, b2_s)

    return out_row[0, :B].reshape(B, 1)


def init_value_net_params(key, state_dim, hidden_dim, dtype=jnp.float32):
    """Deterministic init mimicking torch.nn.Linear (uniform +/- 1/sqrt(fan_in))."""
    k1, k2, k3, k4 = jax.random.split(key, 4)
    bound1 = 1.0 / jnp.sqrt(state_dim)
    bound2 = 1.0 / jnp.sqrt(hidden_dim)
    w1 = jax.random.uniform(k1, (hidden_dim, state_dim), dtype, -bound1, bound1)
    b1 = jax.random.uniform(k2, (hidden_dim,), dtype, -bound1, bound1)
    w2 = jax.random.uniform(k3, (1, hidden_dim), dtype, -bound2, bound2)
    b2 = jax.random.uniform(k4, (1,), dtype, -bound2, bound2)
    return w1, b1, w2, b2


if __name__ == "__main__":
    key = jax.random.PRNGKey(0)
    batch, state_dim, hidden_dim = 8, 4, 32

    k_x, k_p = jax.random.split(key)
    x = jax.random.normal(k_x, (batch, state_dim), jnp.float32)
    w1, b1, w2, b2 = init_value_net_params(k_p, state_dim, hidden_dim)

    fwd = jax.jit(value_net_forward)
    out = jax.block_until_ready(fwd(x, w1, b1, w2, b2))
    assert out.shape == (batch, 1)

    # Tight check: pure-JAX reference with the kernel's exact quantization
    # (bf16 x / W1 / b1 / relu(h) / W2, f32 accumulation everywhere).
    f32 = jnp.float32
    xq = x.astype(jnp.bfloat16).astype(f32)
    w1q = w1.astype(jnp.bfloat16).astype(f32)
    b1q = b1.astype(jnp.bfloat16).astype(f32)
    w2q = w2.astype(jnp.bfloat16).astype(f32)
    hq = jnp.maximum(xq @ w1q.T + b1q, 0.0).astype(jnp.bfloat16).astype(f32)
    ref_q = hq @ w2q.T + b2
    err_q = float(jnp.max(jnp.abs(out - ref_q)))
    assert jnp.allclose(out, ref_q, atol=1e-4, rtol=1e-4), f"quantized-ref err {err_q}"

    # Loose sanity check against full-f32 PyTorch semantics: bf16 operand
    # quantization is the deliberate MXU tradeoff for this PPO value head.
    ref_f = jnp.maximum(x @ w1.T + b1, 0.0) @ w2.T + b2
    err_f = float(jnp.max(jnp.abs(out - ref_f)))
    assert jnp.allclose(out, ref_f, atol=1e-1, rtol=1e-1), f"f32-ref err {err_f}"

    print("KERNEL_OK")
</pallas_src>

<mosaic_0001>
module attributes {stable_mosaic.version = 11 : i64} {
  func.func @value_net_kernel(%arg0: i32, %arg1: memref<5x128xbf16, #tpu.memory_space<vmem>>, %arg2: memref<32x5xbf16, #tpu.memory_space<vmem>>, %arg3: memref<1x32xbf16, #tpu.memory_space<vmem>>, %arg4: memref<1xf32, #tpu.memory_space<smem>>, %arg5: memref<1x128xf32, #tpu.memory_space<vmem>>) attributes {dimension_semantics = [#tpu.dimension_semantics<parallel>], iteration_bounds = array<i64: 1>, scalar_prefetch = 0 : i64, scratch_operands = 0 : i64, tpu.core_type = #tpu.core_type<tc>, window_params = [{transform_indices = @transform_0, window_bounds = array<i64: 5, 128>}, {pipeline_mode = #tpu.pipeline_mode<synchronous>, transform_indices = @transform_1, window_bounds = array<i64: 32, 5>}, {pipeline_mode = #tpu.pipeline_mode<synchronous>, transform_indices = @transform_2, window_bounds = array<i64: 1, 32>}, {transform_indices = @transform_3, window_bounds = array<i64: 1>}, {transform_indices = @transform_4, window_bounds = array<i64: 1, 128>}]} {
    %c0 = arith.constant 0 : index
    %c0_0 = arith.constant 0 : index
    %0 = vector.load %arg2[%c0, %c0_0] : memref<32x5xbf16, #tpu.memory_space<vmem>>, vector<32x5xbf16>
    %c0_1 = arith.constant 0 : index
    %c0_2 = arith.constant 0 : index
    %1 = vector.load %arg1[%c0_1, %c0_2] : memref<5x128xbf16, #tpu.memory_space<vmem>>, vector<5x128xbf16>
    %cst = arith.constant dense<0.000000e+00> : vector<32x128xf32>
    %2 = tpu.matmul %0, %1, %cst {dimension_numbers = #tpu.dot_dimension_numbers<[1], [0], [0], [1], [0, 0, 1, 1], [], []>} : vector<32x5xbf16>, vector<5x128xbf16>, vector<32x128xf32> -> vector<32x128xf32>
    %cst_3 = arith.constant 0.000000e+00 : f32
    %3 = vector.broadcast %cst_3 : f32 to vector<32x128xf32>
    %4 = arith.maximumf %2, %3 : vector<32x128xf32>
    %c0_4 = arith.constant 0 : index
    %c0_5 = arith.constant 0 : index
    %5 = vector.load %arg3[%c0_4, %c0_5] : memref<1x32xbf16, #tpu.memory_space<vmem>>, vector<1x32xbf16>
    %6 = arith.truncf %4 : vector<32x128xf32> to vector<32x128xbf16>
    %cst_6 = arith.constant dense<0.000000e+00> : vector<1x128xf32>
    %7 = tpu.matmul %5, %6, %cst_6 {dimension_numbers = #tpu.dot_dimension_numbers<[1], [0], [0], [1], [0, 0, 1, 1], [], []>} : vector<1x32xbf16>, vector<32x128xbf16>, vector<1x128xf32> -> vector<1x128xf32>
    %c0_7 = arith.constant 0 : index
    %8 = memref.load %arg4[%c0_7] : memref<1xf32, #tpu.memory_space<smem>>
    %9 = vector.broadcast %8 : f32 to vector<1x128xf32>
    %10 = arith.addf %7, %9 : vector<1x128xf32>
    %c0_8 = arith.constant 0 : index
    %c0_9 = arith.constant 0 : index
    %11 = vector.load %arg5[%c0_8, %c0_9] : memref<1x128xf32, #tpu.memory_space<vmem>>, vector<1x128xf32>
    tpu.vector_store %arg5[%c0_8, %c0_9], %10 {strides = array<i32>} : memref<1x128xf32, #tpu.memory_space<vmem>>, vector<1x128xf32>,
    return
  }
  func.func @transform_0(%arg0: i32) -> (i32, i32) {
    %c0_i32 = arith.constant 0 : i32
    %c0_i32_0 = arith.constant 0 : i32
    return %c0_i32, %arg0 : i32, i32
  }
  func.func @transform_1(%arg0: i32) -> (i32, i32) {
    %c0_i32 = arith.constant 0 : i32
    %c0_i32_0 = arith.constant 0 : i32
    %c0_i32_1 = arith.constant 0 : i32
    return %c0_i32, %c0_i32_0 : i32, i32
  }
  func.func @transform_2(%arg0: i32) -> (i32, i32) {
    %c0_i32 = arith.constant 0 : i32
    %c0_i32_0 = arith.constant 0 : i32
    %c0_i32_1 = arith.constant 0 : i32
    return %c0_i32, %c0_i32_0 : i32, i32
  }
  func.func @transform_3(%arg0: i32) -> i32 {
    %c0_i32 = arith.constant 0 : i32
    %c0_i32_0 = arith.constant 0 : i32
    return %c0_i32 : i32
  }
  func.func @transform_4(%arg0: i32) -> (i32, i32) {
    %c0_i32 = arith.constant 0 : i32
    %c0_i32_0 = arith.constant 0 : i32
    return %c0_i32, %arg0 : i32, i32
  }
}

</mosaic_0001>

<bundles_post_ra>
// kernel: value_net_forward.2
= control target key start
LH: loop header
LB: loop body
LE: loop exit
PB: predicated region body
PF: predicated region fallthrough
CT: control target
= control target key end

     0   :  { %s264_s0 = inlined_call_operand.vmem [shape: bf16[32,5], index: 0, kind: input, shape index: {}]   ;;  %s265_s1 = inlined_call_operand.vmem [shape: bf16[1,32], index: 1, kind: input, shape index: {}]   ;;  %s266_s2 = inlined_call_operand.<no memory space> [shape: f32[1], index: 2, kind: input, shape index: {}]   ;;  %s267_s3 = inlined_call_operand.vmem [shape: bf16[4,128], index: 3, kind: input, shape index: {}]   ;;  %s268_s4 = inlined_call_operand.<no memory space> [shape: bf16[], index: 4, kind: input, shape index: {}]   ;;  %s269_s5 = inlined_call_operand.vmem [shape: f32[1,128], index: 5, kind: output, shape index: {}]  }
   0x1   :  { %v10_v0 = vstv %s268_s4 }
   0x2   :  { %v11_v1 = vunpack.i.l.bf16 %v10_v0 }
   0x3   :  { %v30_v2 = vld [vmem:[%s267_s3] sm:$0x3]  ;;  %v33_v3 = vlaneseq  ;;  %vm57_vm0 = vcmask 39936   ;;  %v208_v6 = vmov 0.0   ;;  %vm64_vm2 = vcmask 1041408   ;;  %v207_v15 = vld [vmem:[%s264_s0 + $0x8] sm:$0xff]  }
   0x4   :  { %v206_v4 = vld [vmem:[%s264_s0] sm:$0xff]   ;;  %v31_v5 = vunpack.c.l.bf16 %v30_v2  ;;  %195 = vmatprep.subr.bf16.mxu1 %v208_v6  ;;  %vm65_vm3 = vcmask 1042432   ;;  %v209_v10 = vmov 65535   ;;  %vm210_vm4 = vmmov 0  }
   0x5   :  { %v34_v7 = vshrl.u32 %v33_v3, 7  ;;  %191 = vmatprep.mubr.msk.bf16.mxu0 %vm57_vm0, %v206_v4  ;;  %v66_v11 = vsel %vm64_vm2, 4294967295, %v209_v10  ;;  %199 = vmatprep.mubr.msk.bf16.mxu1 %vm210_vm4, %v208_v6  ;;  %v124_v26 = vld [vmem:[%s265_s1] sm:$0x1]  ;;  %vm129_vm5 = vcmask 261120   ;;  %v128_v27 = vstv %s266_s2 }
   0x6   :  { %v67_v12 = vsel %vm65_vm3, %v66_v11, 0 }
   0x7   :  { %vm36_vm1 = vcmp.lt.s32.totalorder %v34_v7, 4 }
   0x8   :  { %v37_v8 = vsel %vm36_vm1, %v31_v5, %v11_v1 }
   0x9   :  { %v38_v9 = vpack.c.bf16 %v208_v6, %v37_v8 }
   0xb   :  { %40 = vst [vmem:[#allocation8] sm:$0xf] %v38_v9 }
  0x12   :  { %v46_v13 = vld [vmem:[#allocation8] sm:$0x7] }
  0x13   :  { %v69_v14 = vand.u32 %v67_v12, %v46_v13 }
  0x15   :  { %189 = vmatprep.subr.bf16.mxu0 %v69_v14 }
  0x16   :  { %190 = vmatpush3.bf16.msra.mxu0 %v69_v14 }
  0x19   :  { %192 = vmatmul.mubr.msk.bf16.vlgmr.msra.gmra.mrb[0].mxu0 %vm57_vm0, %v207_v15 }
  0xec   :  { %v193_v16 = vpop.f32.mrb[0].mxu0 }
  0xed   :  { %v105_v17 = vpop.f32.mrb[1].mxu0  ;;  %v122_v19 = vmax.f32 %v193_v16, 0.0 }
  0xee   :  { %v194_v18 = vpop.f32.mrb[2].mxu0  ;;  %v120_v22 = vmax.f32 %v105_v17, 0.0 }
  0xef   :  { %v123_v20 = vmax.f32 %v194_v18, 0.0  ;;  %v108_v21 = vpop.f32.mrb[3].mxu0 }
  0xf0   :  { %v121_v23 = vmax.f32 %v108_v21, 0.0 }
  0xf1   :  { %v126_v24 = vpack.c.bf16 %v123_v20, %v122_v19 }
  0xf2   :  { %v125_v25 = vpack.c.bf16 %v121_v23, %v120_v22 }
  0xf4   :  { %196 = vmatpush3.bf16.msra.mxu1 %v125_v25 }
  0xf5   :  { %197 = vmatprep.subr.bf16.mxu1 %v208_v6 }
  0xf8   :  { %198 = vmatpush3.bf16.msra.mxu1 %v126_v24 }
  0xfb   :  { %200 = vmatmul.mubr.msk.bf16.vlgmr.msra.gmra.mrb[0].mxu1 %vm129_vm5, %v124_v26 }
 0x1ce   :  { %v167_v28 = vpop.f32.mrb[0].mxu1 }
 0x1cf   :  { %v168_v29 = vadd.f32 %v167_v28, %v128_v27  ;;  %v201_v30 = vpop.f32.mrb[1].mxu1 }
 0x1d0   :  { %v170_v31 = vpop.f32.mrb[2].mxu1 }
 0x1d1   :  { %173 = vst [vmem:[%s269_s5] sm:$0x1] %v168_v29  ;;  %v202_v32 = vpop.f32.mrb[3].mxu1 }

</bundles_post_ra>
